<compile_context>
chip_gen: v7x
topology: tpu7x:2x2x1
jax: 0.10.0
libtpu: 0.0.40
codegen_flags: <defaults>
</compile_context>

<pallas_src>
import functools
import math

import jax
import jax.numpy as jnp
from jax.experimental import pallas as pl
from jax.experimental.pallas import tpu as pltpu

NEG_INF = -1e30  # large finite negative: avoids inf-inf NaNs on masked rows


# --------------------------------------------------------------- kernel 1
def qkv_rope_kernel(x_ref, w_ref, cos_ref, sin_ref, q_ref, k_ref, v_ref,
                    *, hq, hk, n_heads, n_kv_heads, hd):
    """Fused QKV projection + RoPE, outputs written head-major in bf16.

    Wq/Wk output columns are pre-permuted (host side) into the global
    split-half layout [all re | all im], so rotate_half(x) is a single lane
    concat [-im_half | re_half].  Per-head (TS, hd) slabs (layout [re|im]
    within the head) are then stored directly into head-major outputs, which
    kernels 2/3 consume without any XLA transpose in between.
    """
    n_rep = n_heads // n_kv_heads
    m = hd // 2
    half_q = hq // 2
    half_k = hk // 2

    x = x_ref[0].astype(jnp.bfloat16)                                 # (TS, dim)
    qkv = jnp.dot(x, w_ref[...], preferred_element_type=jnp.float32)  # (TS, HQ+2HK)
    q = qkv[:, :hq]
    k = qkv[:, hq:hq + hk]
    v = qkv[:, hq + hk:]

    # cos/sin arrive as (TS, hd) = [table | table]; broadcast across heads
    # in-kernel (period is m, so plain lane-concat replication is correct).
    cos_hd = cos_ref[...]
    sin_hd = sin_ref[...]
    cos_q = jnp.concatenate([cos_hd] * n_heads, axis=-1)              # (TS, HQ)
    sin_q = jnp.concatenate([sin_hd] * n_heads, axis=-1)
    cos_k = cos_q[:, :hk]
    sin_k = sin_q[:, :hk]

    # rotate-half in the split layout: [-imag | +real]
    q_rot = jnp.concatenate([-q[:, half_q:], q[:, :half_q]], axis=-1)
    k_rot = jnp.concatenate([-k[:, half_k:], k[:, :half_k]], axis=-1)
    q = q * cos_q + q_rot * sin_q
    k = k * cos_k + k_rot * sin_k

    # Head-major stores (static slices; per-head layout is [re(m) | im(m)]).
    for h in range(n_heads):
        q_ref[0, h, :, :] = jnp.concatenate(
            [q[:, h * m:(h + 1) * m],
             q[:, half_q + h * m: half_q + (h + 1) * m]],
            axis=-1).astype(q_ref.dtype)
    for g in range(n_kv_heads):
        k_ref[0, g, :, :] = jnp.concatenate(
            [k[:, g * m:(g + 1) * m],
             k[:, half_k + g * m: half_k + (g + 1) * m]],
            axis=-1).astype(k_ref.dtype)
        v_ref[0, g, :, :] = v[:, g * hd:(g + 1) * hd].astype(v_ref.dtype)


# --------------------------------------------------------------- kernel 2
def flash_attn_kernel(q_ref, k_ref, v_ref, o_ref, m_sc, l_sc, acc_sc, q2_sc,
                      *, scale, tq, tk, n_rep, hd):
    """GQA-amortized flash attention with online softmax.

    grid = (B, n_kv_heads, q_tiles, kv_tiles); kv axis innermost ('arbitrary').
    All n_rep query heads of this kv head are stacked into (n_rep*tq, hd) rows
    (stashed in scratch at ki==0), so K/V tiles are fetched once per group.
    K/V index_maps are causally clamped (no DMA for future tiles); the pl.when
    compute guard below keeps the reused stale block out of the update.
    The causal mask is built only on diagonal-straddling tiles.
    """
    qi = pl.program_id(2)
    ki = pl.program_id(3)
    q_start = qi * tq
    k_start = ki * tk
    rows_total = n_rep * tq

    @pl.when(ki == 0)
    def _init():
        m_sc[...] = jnp.full(m_sc.shape, NEG_INF, m_sc.dtype)
        l_sc[...] = jnp.zeros(l_sc.shape, l_sc.dtype)
        acc_sc[...] = jnp.zeros(acc_sc.shape, acc_sc.dtype)
        # Stack the n_rep query heads once per q tile (bf16, stays in VMEM).
        q2_sc[...] = jnp.concatenate(
            [q_ref[0, j, :, :] for j in range(n_rep)], axis=0)

    def _process(apply_mask):
        q2 = q2_sc[...]                                               # (R, hd) bf16
        k = k_ref[0, 0, :, :]                                         # (tk, hd) bf16
        s = jax.lax.dot_general(q2, k, (((1,), (1,)), ((), ())),
                                preferred_element_type=jnp.float32) * scale
        if apply_mask:  # only on diagonal-straddling tiles
            rows = q_start + jax.lax.broadcasted_iota(jnp.int32, (tq, tk), 0)
            rows = jnp.concatenate([rows] * n_rep, axis=0)            # (R, tk)
            cols = k_start + jax.lax.broadcasted_iota(
                jnp.int32, (rows_total, tk), 1)
            s = jnp.where(rows >= cols, s, NEG_INF)

        m_prev = m_sc[...]
        m_new = jnp.maximum(m_prev, jnp.max(s, axis=-1, keepdims=True))
        alpha = jnp.exp(m_prev - m_new)
        p = jnp.exp(s - m_new)                                        # unnormalized
        l_sc[...] = alpha * l_sc[...] + jnp.sum(p, axis=-1, keepdims=True)
        pv = jnp.dot(p.astype(jnp.bfloat16), v_ref[0, 0, :, :],
                     preferred_element_type=jnp.float32)
        acc_sc[...] = alpha * acc_sc[...] + pv
        m_sc[...] = m_new

    fully_visible = (k_start + tk - 1) <= q_start
    straddling = jnp.logical_and(k_start <= q_start + tq - 1,
                                 (k_start + tk - 1) > q_start)

    @pl.when(fully_visible)          # interior tile: no mask work at all
    def _():
        _process(False)

    @pl.when(straddling)             # diagonal tile: apply causal mask
    def _():
        _process(True)

    @pl.when(ki == pl.num_programs(3) - 1)
    def _finalize():
        inv_l = pl.reciprocal(l_sc[...], approx=True)                 # EUP slot
        out = acc_sc[...] * inv_l                                     # (R, hd) f32
        # (n_rep*tq, hd) head-major rows -> lane-dense (tq, n_rep*hd) group slab
        o_ref[0, 0, :, :] = jnp.concatenate(
            [out[j * tq:(j + 1) * tq, :] for j in range(n_rep)],
            axis=-1).astype(o_ref.dtype)


# --------------------------------------------------------------- kernel 3
def out_proj_kernel(a_ref, wo_ref, o_ref, acc_ref):
    """Output projection with the kv-head axis as an in-grid reduction, so the
    post-attention head transpose never materializes in HBM."""
    g = pl.program_id(2)

    @pl.when(g == 0)
    def _init():
        acc_ref[...] = jnp.zeros(acc_ref.shape, acc_ref.dtype)

    acc_ref[...] += jnp.dot(a_ref[0, 0], wo_ref[0],
                            preferred_element_type=jnp.float32)

    @pl.when(g == pl.num_programs(2) - 1)
    def _finalize():
        o_ref[0] = acc_ref[...].astype(o_ref.dtype)


# --------------------------------------------------------------- wrapper
def _split_half_perm(n_h, head_dim):
    """Output-channel permutation: interleaved (re, im) pairs ->
    global [all re | all im] layout (head-major inside each half)."""
    m = head_dim // 2
    h = jnp.arange(n_h)[:, None]
    j = jnp.arange(m)[None, :]
    re = (h * head_dim + 2 * j).reshape(-1)
    return jnp.concatenate([re, re + 1])


def _tile(n, target):
    """Largest power-of-two-ish divisor of n that is <= target (n if small)."""
    if n <= target:
        return n
    t = target
    while n % t:
        t //= 2
    return max(t, 1)


def attention_forward(x, wq, wk, wv, wo, pos_cos, pos_sin, n_heads, n_kv_heads):
    """x: (B,S,dim); w*: PyTorch layout (out,in); pos_cos/sin: (S, head_dim//2).
    Returns the attention output (past_kv is None in this inference path)."""
    B, S, dim = x.shape
    assert dim % n_heads == 0 and n_heads % n_kv_heads == 0
    hd = dim // n_heads
    assert hd % 2 == 0
    n_rep = n_heads // n_kv_heads
    HQ, HK = n_heads * hd, n_kv_heads * hd
    HQKV = HQ + 2 * HK

    # One-time host-side weight prep: fused bf16 QKV weight with RoPE column
    # permutation on the Q/K parts; Wo grouped per kv head for kernel 3.
    perm_q = _split_half_perm(n_heads, hd)
    perm_k = _split_half_perm(n_kv_heads, hd)
    w_qkv = jnp.concatenate(
        [wq[perm_q, :].T, wk[perm_k, :].T, wv.T], axis=1).astype(jnp.bfloat16)
    wo_g = wo.T.reshape(n_kv_heads, n_rep * hd, dim).astype(jnp.bfloat16)

    # Small RoPE tables: (S, hd) = [table | table]; broadcast across heads
    # happens inside kernel 1.
    cos_hd = jnp.concatenate([pos_cos, pos_cos], axis=-1).astype(jnp.float32)
    sin_hd = jnp.concatenate([pos_sin, pos_sin], axis=-1).astype(jnp.float32)

    # Tile sizes: 256 targets fill the 256-wide MXU on v6e/v7x and cut grid
    # overhead; at the tiny test shapes this degenerates to full-S tiles.
    TS = _tile(S, 256)
    TQ = _tile(S, 256)
    TK = _tile(S, 256)
    assert S % TS == 0 and S % TQ == 0 and S % TK == 0

    # ---- kernel 1: fused QKV projection + RoPE (bf16 head-major outputs)
    q_hm, k_hm, v_hm = pl.pallas_call(
        functools.partial(qkv_rope_kernel, hq=HQ, hk=HK, n_heads=n_heads,
                          n_kv_heads=n_kv_heads, hd=hd),
        out_shape=(jax.ShapeDtypeStruct((B, n_heads, S, hd), jnp.bfloat16),
                   jax.ShapeDtypeStruct((B, n_kv_heads, S, hd), jnp.bfloat16),
                   jax.ShapeDtypeStruct((B, n_kv_heads, S, hd), jnp.bfloat16)),
        grid=(B, S // TS),
        in_specs=[
            pl.BlockSpec((1, TS, dim), lambda b, s: (b, s, 0)),       # x
            pl.BlockSpec((dim, HQKV), lambda b, s: (0, 0)),           # fused W (bf16)
            pl.BlockSpec((TS, hd), lambda b, s: (s, 0)),              # cos (S, hd)
            pl.BlockSpec((TS, hd), lambda b, s: (s, 0)),              # sin (S, hd)
        ],
        out_specs=(
            pl.BlockSpec((1, n_heads, TS, hd), lambda b, s: (b, 0, s, 0)),
            pl.BlockSpec((1, n_kv_heads, TS, hd), lambda b, s: (b, 0, s, 0)),
            pl.BlockSpec((1, n_kv_heads, TS, hd), lambda b, s: (b, 0, s, 0)),
        ),
        compiler_params=pltpu.CompilerParams(
            dimension_semantics=("parallel", "parallel")),
    )(x, w_qkv, cos_hd, sin_hd)

    # ---- kernel 2: GQA-amortized flash attention
    # Causally-clamped K/V index_map: tiles entirely in the future reuse the
    # resident block (no new DMA); the in-kernel pl.when guard skips compute.
    def kv_index(b, g, qi, ki):
        last = (qi * TQ + TQ - 1) // TK
        return (b, g, jnp.minimum(ki, last), 0)

    attn = pl.pallas_call(
        functools.partial(flash_attn_kernel, scale=1.0 / math.sqrt(hd),
                          tq=TQ, tk=TK, n_rep=n_rep, hd=hd),
        out_shape=jax.ShapeDtypeStruct((B, n_kv_heads, S, n_rep * hd),
                                       jnp.bfloat16),
        grid=(B, n_kv_heads, S // TQ, S // TK),
        in_specs=[
            pl.BlockSpec((1, n_rep, TQ, hd),
                         lambda b, g, qi, ki: (b, g, qi, 0)),         # Q (all heads of group)
            pl.BlockSpec((1, 1, TK, hd), kv_index),                   # K (clamped)
            pl.BlockSpec((1, 1, TK, hd), kv_index),                   # V (clamped)
        ],
        out_specs=pl.BlockSpec((1, 1, TQ, n_rep * hd),
                               lambda b, g, qi, ki: (b, g, qi, 0)),
        scratch_shapes=[
            pltpu.VMEM((n_rep * TQ, 1), jnp.float32),                 # running max
            pltpu.VMEM((n_rep * TQ, 1), jnp.float32),                 # running sum
            pltpu.VMEM((n_rep * TQ, hd), jnp.float32),                # accumulator
            pltpu.VMEM((n_rep * TQ, hd), jnp.bfloat16),               # stacked Q
        ],
        compiler_params=pltpu.CompilerParams(
            dimension_semantics=("parallel", "parallel", "parallel",
                                 "arbitrary")),
    )(q_hm, k_hm, v_hm)

    # ---- kernel 3: output projection with kv-head reduction axis
    out = pl.pallas_call(
        out_proj_kernel,
        out_shape=jax.ShapeDtypeStruct((B, S, dim), x.dtype),
        grid=(B, S // TS, n_kv_heads),
        in_specs=[
            pl.BlockSpec((1, 1, TS, n_rep * hd),
                         lambda b, si, g: (b, g, si, 0)),             # attn group slab
            pl.BlockSpec((1, n_rep * hd, dim),
                         lambda b, si, g: (g, 0, 0)),                 # Wo rows of group
        ],
        out_specs=pl.BlockSpec((1, TS, dim), lambda b, si, g: (b, si, 0)),
        scratch_shapes=[pltpu.VMEM((TS, dim), jnp.float32)],
        compiler_params=pltpu.CompilerParams(
            dimension_semantics=("parallel", "parallel", "arbitrary")),
    )(attn, wo_g)
    return out


# --------------------------------------------------------------- reference
def reference(x, wq, wk, wv, wo, cos, sin, n_heads, n_kv_heads):
    """Pure-JAX mirror of the PyTorch forward (dropout=0, no KV cache)."""
    B, S, dim = x.shape
    hd = dim // n_heads
    n_rep = n_heads // n_kv_heads
    q = x @ wq.T
    k = x @ wk.T
    v = x @ wv.T
    q = q.reshape(B, S, n_heads, hd)
    k = k.reshape(B, S, n_kv_heads, hd)
    v = v.reshape(B, S, n_kv_heads, hd)

    def rope(t):
        tr = t.reshape(*t.shape[:-1], hd // 2, 2)
        re, im = tr[..., 0], tr[..., 1]
        c = cos[None, :, None, :]
        s = sin[None, :, None, :]
        o_re = re * c - im * s
        o_im = re * s + im * c
        return jnp.stack([o_re, o_im], axis=-1).reshape(t.shape)

    q, k = rope(q), rope(k)
    k = jnp.repeat(k, n_rep, axis=2)
    v = jnp.repeat(v, n_rep, axis=2)
    q, k, v = (a.transpose(0, 2, 1, 3) for a in (q, k, v))
    s = (q @ jnp.swapaxes(k, -1, -2)) / math.sqrt(hd)
    s = s + jnp.triu(jnp.full((S, S), -jnp.inf, jnp.float32), k=1)
    p = jax.nn.softmax(s, axis=-1)
    o = (p @ v).transpose(0, 2, 1, 3).reshape(B, S, dim)
    return o @ wo.T


if __name__ == "__main__":
    B, S, dim = 2, 8, 32
    n_heads, n_kv_heads = 4, 2
    hd = dim // n_heads

    key = jax.random.PRNGKey(0)
    kx, kq, kk, kv, ko = jax.random.split(key, 5)
    x = jax.random.normal(kx, (B, S, dim), jnp.float32)
    w_scale = 0.05
    wq = jax.random.normal(kq, (n_heads * hd, dim), jnp.float32) * w_scale
    wk = jax.random.normal(kk, (n_kv_heads * hd, dim), jnp.float32) * w_scale
    wv = jax.random.normal(kv, (n_kv_heads * hd, dim), jnp.float32) * w_scale
    wo = jax.random.normal(ko, (dim, dim), jnp.float32) * w_scale

    # pos_cis equivalent: cos/sin of shape (S, hd//2), theta = 10000
    inv_freq = 1.0 / (10000.0 ** (jnp.arange(0, hd, 2, dtype=jnp.float32) / hd))
    freqs = jnp.outer(jnp.arange(S, dtype=jnp.float32), inv_freq)
    pos_cos, pos_sin = jnp.cos(freqs), jnp.sin(freqs)

    out = attention_forward(x, wq, wk, wv, wo, pos_cos, pos_sin,
                            n_heads, n_kv_heads)
    out = jax.block_until_ready(out)

    ref = reference(x, wq, wk, wv, wo, pos_cos, pos_sin, n_heads, n_kv_heads)
    assert out.shape == (B, S, dim)
    assert jnp.allclose(out, ref, atol=1e-2, rtol=1e-2), "mismatch vs JAX reference"
    print("KERNEL_OK")
</pallas_src>

<mosaic_0001>
module attributes {stable_mosaic.version = 11 : i64} {
  func.func @qkv_rope_kernel(%arg0: i32, %arg1: i32, %arg2: memref<1x8x32xf32, #tpu.memory_space<vmem>>, %arg3: memref<32x64xbf16, #tpu.memory_space<vmem>>, %arg4: memref<8x8xf32, #tpu.memory_space<vmem>>, %arg5: memref<8x8xf32, #tpu.memory_space<vmem>>, %arg6: memref<1x4x8x8xbf16, #tpu.memory_space<vmem>>, %arg7: memref<1x2x8x8xbf16, #tpu.memory_space<vmem>>, %arg8: memref<1x2x8x8xbf16, #tpu.memory_space<vmem>>) attributes {dimension_semantics = [#tpu.dimension_semantics<parallel>, #tpu.dimension_semantics<parallel>], iteration_bounds = array<i64: 2, 1>, scalar_prefetch = 0 : i64, scratch_operands = 0 : i64, tpu.core_type = #tpu.core_type<tc>, window_params = [{transform_indices = @transform_0, window_bounds = array<i64: 1, 8, 32>}, {pipeline_mode = #tpu.pipeline_mode<synchronous>, transform_indices = @transform_1, window_bounds = array<i64: 32, 64>}, {transform_indices = @transform_2, window_bounds = array<i64: 8, 8>}, {transform_indices = @transform_3, window_bounds = array<i64: 8, 8>}, {transform_indices = @transform_4, window_bounds = array<i64: 1, 4, 8, 8>}, {transform_indices = @transform_5, window_bounds = array<i64: 1, 2, 8, 8>}, {transform_indices = @transform_6, window_bounds = array<i64: 1, 2, 8, 8>}]} {
    %c0 = arith.constant 0 : index
    %c0_0 = arith.constant 0 : index
    %c0_1 = arith.constant 0 : index
    %0 = vector.load %arg2[%c0, %c0_0, %c0_1] : memref<1x8x32xf32, #tpu.memory_space<vmem>>, vector<1x8x32xf32>
    %1 = vector.shape_cast %0 : vector<1x8x32xf32> to vector<8x32xf32>
    %2 = arith.truncf %1 : vector<8x32xf32> to vector<8x32xbf16>
    %c0_2 = arith.constant 0 : index
    %c0_3 = arith.constant 0 : index
    %3 = vector.load %arg3[%c0_2, %c0_3] : memref<32x64xbf16, #tpu.memory_space<vmem>>, vector<32x64xbf16>
    %cst = arith.constant dense<0.000000e+00> : vector<8x64xf32>
    %4 = tpu.matmul %2, %3, %cst {dimension_numbers = #tpu.dot_dimension_numbers<[1], [0], [0], [1], [0, 0, 1, 1], [], []>} : vector<8x32xbf16>, vector<32x64xbf16>, vector<8x64xf32> -> vector<8x64xf32>
    %5 = vector.extract_strided_slice %4 {offsets = [0, 0], sizes = [8, 32], strides = [1, 1]} : vector<8x64xf32> to vector<8x32xf32>
    %6 = vector.extract_strided_slice %4 {offsets = [0, 32], sizes = [8, 16], strides = [1, 1]} : vector<8x64xf32> to vector<8x16xf32>
    %7 = vector.extract_strided_slice %4 {offsets = [0, 48], sizes = [8, 16], strides = [1, 1]} : vector<8x64xf32> to vector<8x16xf32>
    %c0_4 = arith.constant 0 : index
    %c0_5 = arith.constant 0 : index
    %8 = vector.load %arg4[%c0_4, %c0_5] : memref<8x8xf32, #tpu.memory_space<vmem>>, vector<8x8xf32>
    %c0_6 = arith.constant 0 : index
    %c0_7 = arith.constant 0 : index
    %9 = vector.load %arg5[%c0_6, %c0_7] : memref<8x8xf32, #tpu.memory_space<vmem>>, vector<8x8xf32>
    %10 = tpu.concatenate %8, %8, %8, %8 in 1 : vector<8x8xf32>, vector<8x8xf32>, vector<8x8xf32>, vector<8x8xf32> -> vector<8x32xf32>
    %11 = tpu.concatenate %9, %9, %9, %9 in 1 : vector<8x8xf32>, vector<8x8xf32>, vector<8x8xf32>, vector<8x8xf32> -> vector<8x32xf32>
    %12 = vector.extract_strided_slice %10 {offsets = [0, 0], sizes = [8, 16], strides = [1, 1]} : vector<8x32xf32> to vector<8x16xf32>
    %13 = vector.extract_strided_slice %11 {offsets = [0, 0], sizes = [8, 16], strides = [1, 1]} : vector<8x32xf32> to vector<8x16xf32>
    %14 = vector.extract_strided_slice %5 {offsets = [0, 16], sizes = [8, 16], strides = [1, 1]} : vector<8x32xf32> to vector<8x16xf32>
    %cst_8 = arith.constant 0.000000e+00 : f32
    %15 = vector.broadcast %cst_8 : f32 to vector<8x16xf32>
    %16 = arith.subf %15, %14 : vector<8x16xf32>
    %17 = vector.extract_strided_slice %5 {offsets = [0, 0], sizes = [8, 16], strides = [1, 1]} : vector<8x32xf32> to vector<8x16xf32>
    %18 = tpu.concatenate %16, %17 in 1 : vector<8x16xf32>, vector<8x16xf32> -> vector<8x32xf32>
    %19 = vector.extract_strided_slice %6 {offsets = [0, 8], sizes = [8, 8], strides = [1, 1]} : vector<8x16xf32> to vector<8x8xf32>
    %cst_9 = arith.constant 0.000000e+00 : f32
    %20 = vector.broadcast %cst_9 : f32 to vector<8x8xf32>
    %21 = arith.subf %20, %19 : vector<8x8xf32>
    %22 = vector.extract_strided_slice %6 {offsets = [0, 0], sizes = [8, 8], strides = [1, 1]} : vector<8x16xf32> to vector<8x8xf32>
    %23 = tpu.concatenate %21, %22 in 1 : vector<8x8xf32>, vector<8x8xf32> -> vector<8x16xf32>
    %24 = arith.mulf %5, %10 : vector<8x32xf32>
    %25 = arith.mulf %18, %11 : vector<8x32xf32>
    %26 = arith.addf %24, %25 : vector<8x32xf32>
    %27 = arith.mulf %6, %12 : vector<8x16xf32>
    %28 = arith.mulf %23, %13 : vector<8x16xf32>
    %29 = arith.addf %27, %28 : vector<8x16xf32>
    %30 = vector.extract_strided_slice %26 {offsets = [0, 0], sizes = [8, 4], strides = [1, 1]} : vector<8x32xf32> to vector<8x4xf32>
    %31 = vector.extract_strided_slice %26 {offsets = [0, 16], sizes = [8, 4], strides = [1, 1]} : vector<8x32xf32> to vector<8x4xf32>
    %32 = tpu.concatenate %30, %31 in 1 : vector<8x4xf32>, vector<8x4xf32> -> vector<8x8xf32>
    %33 = arith.truncf %32 : vector<8x8xf32> to vector<8x8xbf16>
    %c0_10 = arith.constant 0 : index
    %c0_11 = arith.constant 0 : index
    %c0_12 = arith.constant 0 : index
    %c0_13 = arith.constant 0 : index
    %34 = vector.load %arg6[%c0_10, %c0_11, %c0_12, %c0_13] : memref<1x4x8x8xbf16, #tpu.memory_space<vmem>>, vector<1x1x8x8xbf16>
    %35 = vector.shape_cast %34 : vector<1x1x8x8xbf16> to vector<8x8xbf16>
    %36 = vector.shape_cast %33 : vector<8x8xbf16> to vector<1x1x8x8xbf16>
    tpu.vector_store %arg6[%c0_10, %c0_11, %c0_12, %c0_13], %36 {strides = array<i32>} : memref<1x4x8x8xbf16, #tpu.memory_space<vmem>>, vector<1x1x8x8xbf16>,
    %37 = vector.extract_strided_slice %26 {offsets = [0, 4], sizes = [8, 4], strides = [1, 1]} : vector<8x32xf32> to vector<8x4xf32>
    %38 = vector.extract_strided_slice %26 {offsets = [0, 20], sizes = [8, 4], strides = [1, 1]} : vector<8x32xf32> to vector<8x4xf32>
    %39 = tpu.concatenate %37, %38 in 1 : vector<8x4xf32>, vector<8x4xf32> -> vector<8x8xf32>
    %40 = arith.truncf %39 : vector<8x8xf32> to vector<8x8xbf16>
    %c0_14 = arith.constant 0 : index
    %c1 = arith.constant 1 : index
    %c0_15 = arith.constant 0 : index
    %c0_16 = arith.constant 0 : index
    %41 = vector.load %arg6[%c0_14, %c1, %c0_15, %c0_16] : memref<1x4x8x8xbf16, #tpu.memory_space<vmem>>, vector<1x1x8x8xbf16>
    %42 = vector.shape_cast %41 : vector<1x1x8x8xbf16> to vector<8x8xbf16>
    %43 = vector.shape_cast %40 : vector<8x8xbf16> to vector<1x1x8x8xbf16>
    tpu.vector_store %arg6[%c0_14, %c1, %c0_15, %c0_16], %43 {strides = array<i32>} : memref<1x4x8x8xbf16, #tpu.memory_space<vmem>>, vector<1x1x8x8xbf16>,
    %44 = vector.extract_strided_slice %26 {offsets = [0, 8], sizes = [8, 4], strides = [1, 1]} : vector<8x32xf32> to vector<8x4xf32>
    %45 = vector.extract_strided_slice %26 {offsets = [0, 24], sizes = [8, 4], strides = [1, 1]} : vector<8x32xf32> to vector<8x4xf32>
    %46 = tpu.concatenate %44, %45 in 1 : vector<8x4xf32>, vector<8x4xf32> -> vector<8x8xf32>
    %47 = arith.truncf %46 : vector<8x8xf32> to vector<8x8xbf16>
    %c0_17 = arith.constant 0 : index
    %c2 = arith.constant 2 : index
    %c0_18 = arith.constant 0 : index
    %c0_19 = arith.constant 0 : index
    %48 = vector.load %arg6[%c0_17, %c2, %c0_18, %c0_19] : memref<1x4x8x8xbf16, #tpu.memory_space<vmem>>, vector<1x1x8x8xbf16>
    %49 = vector.shape_cast %48 : vector<1x1x8x8xbf16> to vector<8x8xbf16>
    %50 = vector.shape_cast %47 : vector<8x8xbf16> to vector<1x1x8x8xbf16>
    tpu.vector_store %arg6[%c0_17, %c2, %c0_18, %c0_19], %50 {strides = array<i32>} : memref<1x4x8x8xbf16, #tpu.memory_space<vmem>>, vector<1x1x8x8xbf16>,
    %51 = vector.extract_strided_slice %26 {offsets = [0, 12], sizes = [8, 4], strides = [1, 1]} : vector<8x32xf32> to vector<8x4xf32>
    %52 = vector.extract_strided_slice %26 {offsets = [0, 28], sizes = [8, 4], strides = [1, 1]} : vector<8x32xf32> to vector<8x4xf32>
    %53 = tpu.concatenate %51, %52 in 1 : vector<8x4xf32>, vector<8x4xf32> -> vector<8x8xf32>
    %54 = arith.truncf %53 : vector<8x8xf32> to vector<8x8xbf16>
    %c0_20 = arith.constant 0 : index
    %c3 = arith.constant 3 : index
    %c0_21 = arith.constant 0 : index
    %c0_22 = arith.constant 0 : index
    %55 = vector.load %arg6[%c0_20, %c3, %c0_21, %c0_22] : memref<1x4x8x8xbf16, #tpu.memory_space<vmem>>, vector<1x1x8x8xbf16>
    %56 = vector.shape_cast %55 : vector<1x1x8x8xbf16> to vector<8x8xbf16>
    %57 = vector.shape_cast %54 : vector<8x8xbf16> to vector<1x1x8x8xbf16>
    tpu.vector_store %arg6[%c0_20, %c3, %c0_21, %c0_22], %57 {strides = array<i32>} : memref<1x4x8x8xbf16, #tpu.memory_space<vmem>>, vector<1x1x8x8xbf16>,
    %58 = vector.extract_strided_slice %29 {offsets = [0, 0], sizes = [8, 4], strides = [1, 1]} : vector<8x16xf32> to vector<8x4xf32>
    %59 = vector.extract_strided_slice %29 {offsets = [0, 8], sizes = [8, 4], strides = [1, 1]} : vector<8x16xf32> to vector<8x4xf32>
    %60 = tpu.concatenate %58, %59 in 1 : vector<8x4xf32>, vector<8x4xf32> -> vector<8x8xf32>
    %61 = arith.truncf %60 : vector<8x8xf32> to vector<8x8xbf16>
    %c0_23 = arith.constant 0 : index
    %c0_24 = arith.constant 0 : index
    %c0_25 = arith.constant 0 : index
    %c0_26 = arith.constant 0 : index
    %62 = vector.load %arg7[%c0_23, %c0_24, %c0_25, %c0_26] : memref<1x2x8x8xbf16, #tpu.memory_space<vmem>>, vector<1x1x8x8xbf16>
    %63 = vector.shape_cast %62 : vector<1x1x8x8xbf16> to vector<8x8xbf16>
    %64 = vector.shape_cast %61 : vector<8x8xbf16> to vector<1x1x8x8xbf16>
    tpu.vector_store %arg7[%c0_23, %c0_24, %c0_25, %c0_26], %64 {strides = array<i32>} : memref<1x2x8x8xbf16, #tpu.memory_space<vmem>>, vector<1x1x8x8xbf16>,
    %65 = vector.extract_strided_slice %7 {offsets = [0, 0], sizes = [8, 8], strides = [1, 1]} : vector<8x16xf32> to vector<8x8xf32>
    %66 = arith.truncf %65 : vector<8x8xf32> to vector<8x8xbf16>
    %c0_27 = arith.constant 0 : index
    %c0_28 = arith.constant 0 : index
    %c0_29 = arith.constant 0 : index
    %c0_30 = arith.constant 0 : index
    %67 = vector.load %arg8[%c0_27, %c0_28, %c0_29, %c0_30] : memref<1x2x8x8xbf16, #tpu.memory_space<vmem>>, vector<1x1x8x8xbf16>
    %68 = vector.shape_cast %67 : vector<1x1x8x8xbf16> to vector<8x8xbf16>
    %69 = vector.shape_cast %66 : vector<8x8xbf16> to vector<1x1x8x8xbf16>
    tpu.vector_store %arg8[%c0_27, %c0_28, %c0_29, %c0_30], %69 {strides = array<i32>} : memref<1x2x8x8xbf16, #tpu.memory_space<vmem>>, vector<1x1x8x8xbf16>,
    %70 = vector.extract_strided_slice %29 {offsets = [0, 4], sizes = [8, 4], strides = [1, 1]} : vector<8x16xf32> to vector<8x4xf32>
    %71 = vector.extract_strided_slice %29 {offsets = [0, 12], sizes = [8, 4], strides = [1, 1]} : vector<8x16xf32> to vector<8x4xf32>
    %72 = tpu.concatenate %70, %71 in 1 : vector<8x4xf32>, vector<8x4xf32> -> vector<8x8xf32>
    %73 = arith.truncf %72 : vector<8x8xf32> to vector<8x8xbf16>
    %c0_31 = arith.constant 0 : index
    %c1_32 = arith.constant 1 : index
    %c0_33 = arith.constant 0 : index
    %c0_34 = arith.constant 0 : index
    %74 = vector.load %arg7[%c0_31, %c1_32, %c0_33, %c0_34] : memref<1x2x8x8xbf16, #tpu.memory_space<vmem>>, vector<1x1x8x8xbf16>
    %75 = vector.shape_cast %74 : vector<1x1x8x8xbf16> to vector<8x8xbf16>
    %76 = vector.shape_cast %73 : vector<8x8xbf16> to vector<1x1x8x8xbf16>
    tpu.vector_store %arg7[%c0_31, %c1_32, %c0_33, %c0_34], %76 {strides = array<i32>} : memref<1x2x8x8xbf16, #tpu.memory_space<vmem>>, vector<1x1x8x8xbf16>,
    %77 = vector.extract_strided_slice %7 {offsets = [0, 8], sizes = [8, 8], strides = [1, 1]} : vector<8x16xf32> to vector<8x8xf32>
    %78 = arith.truncf %77 : vector<8x8xf32> to vector<8x8xbf16>
    %c0_35 = arith.constant 0 : index
    %c1_36 = arith.constant 1 : index
    %c0_37 = arith.constant 0 : index
    %c0_38 = arith.constant 0 : index
    %79 = vector.load %arg8[%c0_35, %c1_36, %c0_37, %c0_38] : memref<1x2x8x8xbf16, #tpu.memory_space<vmem>>, vector<1x1x8x8xbf16>
    %80 = vector.shape_cast %79 : vector<1x1x8x8xbf16> to vector<8x8xbf16>
    %81 = vector.shape_cast %78 : vector<8x8xbf16> to vector<1x1x8x8xbf16>
    tpu.vector_store %arg8[%c0_35, %c1_36, %c0_37, %c0_38], %81 {strides = array<i32>} : memref<1x2x8x8xbf16, #tpu.memory_space<vmem>>, vector<1x1x8x8xbf16>,
    return
  }
  func.func @transform_0(%arg0: i32, %arg1: i32) -> (i32, i32, i32) {
    %c0_i32 = arith.constant 0 : i32
    %c0_i32_0 = arith.constant 0 : i32
    return %arg0, %arg1, %c0_i32 : i32, i32, i32
  }
  func.func @transform_1(%arg0: i32, %arg1: i32) -> (i32, i32) {
    %c0_i32 = arith.constant 0 : i32
    %c0_i32_0 = arith.constant 0 : i32
    %c0_i32_1 = arith.constant 0 : i32
    return %c0_i32, %c0_i32_0 : i32, i32
  }
  func.func @transform_2(%arg0: i32, %arg1: i32) -> (i32, i32) {
    %c0_i32 = arith.constant 0 : i32
    %c0_i32_0 = arith.constant 0 : i32
    return %arg1, %c0_i32 : i32, i32
  }
  func.func @transform_3(%arg0: i32, %arg1: i32) -> (i32, i32) {
    %c0_i32 = arith.constant 0 : i32
    %c0_i32_0 = arith.constant 0 : i32
    return %arg1, %c0_i32 : i32, i32
  }
  func.func @transform_4(%arg0: i32, %arg1: i32) -> (i32, i32, i32, i32) {
    %c0_i32 = arith.constant 0 : i32
    %c0_i32_0 = arith.constant 0 : i32
    %c0_i32_1 = arith.constant 0 : i32
    return %arg0, %c0_i32, %arg1, %c0_i32_0 : i32, i32, i32, i32
  }
  func.func @transform_5(%arg0: i32, %arg1: i32) -> (i32, i32, i32, i32) {
    %c0_i32 = arith.constant 0 : i32
    %c0_i32_0 = arith.constant 0 : i32
    %c0_i32_1 = arith.constant 0 : i32
    return %arg0, %c0_i32, %arg1, %c0_i32_0 : i32, i32, i32, i32
  }
  func.func @transform_6(%arg0: i32, %arg1: i32) -> (i32, i32, i32, i32) {
    %c0_i32 = arith.constant 0 : i32
    %c0_i32_0 = arith.constant 0 : i32
    %c0_i32_1 = arith.constant 0 : i32
    return %arg0, %c0_i32, %arg1, %c0_i32_0 : i32, i32, i32, i32
  }
}

</mosaic_0001>

<bundles_post_ra>
// kernel: tpu_custom_call.1
= control target key start
LH: loop header
LB: loop body
LE: loop exit
PB: predicated region body
PF: predicated region fallthrough
CT: control target
= control target key end

     0   :  { %12 = vsyncpa [#allocation3], 0  ;;  %s1614_s0 = inlined_call_operand.hbm [shape: f32[2,8,32], index: 0, kind: input, shape index: {}]   ;;  %s1615_s1 = inlined_call_operand.hbm [shape: bf16[32,64], index: 1, kind: input, shape index: {}]   ;;  %s1616_s2 = inlined_call_operand.hbm [shape: f32[8,8], index: 2, kind: input, shape index: {}]   ;;  %s1617_s3 = inlined_call_operand.vmem [shape: f32[8,8], index: 3, kind: input, shape index: {}]   ;;  %s1618_s4 = inlined_call_operand.hbm [shape: bf16[2,4,8,8], index: 4, kind: output, shape index: {0}]   ;;  %s1619_s5 = inlined_call_operand.hbm [shape: bf16[2,2,8,8], index: 5, kind: output, shape index: {1}]   ;;  %s1620_s6 = inlined_call_operand.hbm [shape: bf16[2,2,8,8], index: 6, kind: output, shape index: {2}]  }
   0x1   :  { %14 = vsyncpa [#allocation3 + $0x1], 0 }
   0x2   :  { %15 = vsyncpa [#allocation6], 0 }
   0x3   :  { %16 = vsyncpa [#allocation4], 0 }
   0x4   :  { %18 = vsyncpa [#allocation4 + $0x1], 0 }
   0x5   :  { %19 = vsyncpa [#allocation10], 0 }
   0x6   :  { %21 = vsyncpa [#allocation10 + $0x1], 0  ;;  %s1255_s21 = smov 0   ;;  %s1257_s22 = smov 0  }
   0x7   :  { %s1259_s23 = smov 0   ;;  %s1261_s24 = smov 0  }
   0x8   :  { %s1263_s25 = smov 0   ;;  %s1265_s26 = smov 0  }
   0x9 LB: > { %s1286_s27 = sadd.s32 4294967295, %s1191_s26   ;;  %s1622_s28 = sadd.s32 4294967294, %s1191_s26   ;;  %s1191_s26 = sphi %s1265_s26, %s27_s26   ;;  %s1187_s25 = sphi %s1263_s25, %s1649_s25   ;;  %s1183_s24 = sphi %s1261_s24, %s1648_s24   ;;  %s1179_s23 = sphi %s1259_s23, %s1647_s23   ;;  %s1175_s22 = sphi %s1257_s22, %s1646_s22   ;;  %s1171_s21 = sphi %s1255_s21, %s1645_s21  }
   0xa   : > { %p61_p0 = scmp.ne.s32.totalorder %s1175_s22, %s1171_s21  ;;  %p1621_p1 = scmp.eq.s32.totalorder %s1286_s27, 0 }
   0xb   : > { %p166_p3 = scmp.eq.s32.totalorder %s1622_s28, 1  ;;  %p794_p5 = scmp.ge.s32.totalorder %s1191_s26, 1 }
   0xc   : > { %p1297_p4 = por %p1621_p1, %p61_p0  ;;  %p229_p7 = scmp.lt.s32.totalorder %s1191_s26, 3 }
   0xd   : > { %p1302_p6 = por %p166_p3, %p61_p0  ;;  %s1193_s8 = smov [#allocation5]  }
   0xe   : > { %s1629_s29 = scalar_select %p1297_p4, 1, 0 }
   0xf   : > { %s1630_s30 = scalar_select %p1302_p6, 1, 0 }
  0x10   : > { %p1307_p8 = pnand %p794_p5, %p229_p7  ;;  %s241_s9 = sshll.u32 %s1193_s8, 4  ;;  %s1311_s9 = int_to_ptr.vmem [resolvable:$true] %s241_s9 }
  0x11   : > { %s1194_s11 = smov [#allocation7]   ;;  %s959_s15 = scalar_lea.hbm %s1615_s1, 256 }
  0x12   : > { %p859_p9 = pneg %p1307_p8  ;;  %s257_s12 = sshll.u32 %s1194_s11, 4  ;;  %s1322_s12 = int_to_ptr.vmem [resolvable:$true] %s257_s12 }
  0x13   : > { %p960_p12 = scmp.ne.s32.totalorder %s1615_s1, %s959_s15  ;;  %p966_p5 = scmp.lt.u32.totalorder %s959_s15, %s1615_s1 }
  0x14   : > { %p1318_p11 = pnand %p859_p9, %p1621_p1 }
  0x16   : > { %p961_p13 = pneg %p1318_p11 }
  0x18   : > { %p962_p0 = pnand %p961_p13, %p960_p12 }
  0x1a   : > { %p963_p3 = pneg %p962_p0 }
  0x1c   : > { %p968_p7 = pnand %p966_p5, %p963_p3 }
  0x1e   : > { %971 = shalt.err (!%p968_p7)
}
  0x1f   : > { %s972_s20 = scalar_lea.vmem %s1311_s9, 256  ;;  %p980_p2 = scmp.lt.s32.totalorder %s1311_s9, %s1311_s9 }
  0x20   : > { %p973_p9 = scmp.ne.s32.totalorder %s1311_s9, %s972_s20  ;;  %p981_p12 = scmp.lt.s32.totalorder %s972_s20, %s972_s20 }
  0x22   : > { %p975_p10 = pnand %p973_p9, %p961_p13  ;;  %p982_p0 = por %p981_p12, %p980_p2 }
  0x24   : > { %p976_p1 = pneg %p975_p10 }
  0x26   : > { %p983_p6 = pnand %p982_p0, %p976_p1 }
  0x28   : > { %986 = shalt.err (!%p983_p6)
}
  0x29   : > { %s1195_s8 = smov 64   ;;  %s1196_s11 = smov 4  }
  0x2a   : > { %862 = dma.hbm_to_vmem [thread:$0]  (!%p1318_p11), %s1615_s1, 256, %s1311_s9, [#allocation6], %s1195_s8, %s1195_s8, %s1196_s11  }
  0x2b   : > { %s987_s17 = scalar_lea.hbm %s1616_s2, 128 }
  0x2c   : > { %p988_p2 = scmp.ne.s32.totalorder %s1616_s2, %s987_s17  ;;  %p994_p10 = scmp.lt.u32.totalorder %s987_s17, %s1616_s2 }
  0x2e   : > { %p990_p1 = pnand %p988_p2, %p961_p13 }
  0x30   : > { %p991_p6 = pneg %p990_p1 }
  0x32   : > { %p996_p3 = pnand %p994_p10, %p991_p6 }
  0x34   : > { %999 = shalt.err (!%p996_p3)
}
  0x35   : > { %s1000_s9 = scalar_lea.vmem %s1322_s12, 128  ;;  %p1008_p12 = scmp.lt.s32.totalorder %s1322_s12, %s1322_s12 }
  0x36   : > { %p1001_p5 = scmp.ne.s32.totalorder %s1322_s12, %s1000_s9  ;;  %p1009_p0 = scmp.lt.s32.totalorder %s1000_s9, %s1000_s9 }
  0x38   : > { %p1003_p7 = pnand %p1001_p5, %p961_p13  ;;  %p1010_p2 = por %p1009_p0, %p1008_p12 }
  0x3a   : > { %p1004_p9 = pneg %p1003_p7 }
  0x3c   : > { %p1011_p1 = pnand %p1010_p2, %p1004_p9 }
  0x3e   : > { %1014 = shalt.err (!%p1011_p1)
}
  0x3f   : > { %865 = dma.hbm_to_vmem [thread:$0]  (!%p1318_p11), %s1616_s2, 128, %s1322_s12, [#allocation6]  }
  0x40   : > { %s39_s11 = sadd.s32 1, %s1187_s25  ;;  %s48_s13 = sadd.s32 1, %s1179_s23 }
  0x41   : > { %p41_p13 = scmp.ge.s32.totalorder %s39_s11, 2  ;;  %p55_p6 = scmp.ne.s32.totalorder %s1179_s23, %s1175_s22 }
  0x42   : > { %p56_p10 = scmp.eq.s32.totalorder %s1191_s26, 0  ;;  %p882_p3 = scmp.lt.s32.totalorder %s1191_s26, 2 }
  0x43   : > { %s1651_s11 = smov (%p41_p13, %s39_s11), 0  ;;  %p1633_p7 = scmp.eq.s32.totalorder %s1286_s27, 1 }
  0x44   : > { %p57_p5 = por %p56_p10, %p55_p6  ;;  %s43_s14 = ssub.s32 %s1187_s25, %s1651_s11 }
  0x45   : > { %p1386_p9 = por %p1633_p7, %p55_p6  ;;  %s275_s15 = sand.u32 1, %s1179_s23  }
  0x46   : > { %p46_p12 = scmp.eq.s32.totalorder %s43_s14, 0  ;;  %s799_s12 = sshll.u32 %s275_s15, 3 }
  0x47   : > { %s1634_s10 = scalar_select %p1386_p9, 1, 0 }
  0x48   : > { %s800_s16 = sshll.u32 %s1187_s25, 7  ;;  %s279_s9 = scalar_lea.vmem [#allocation2], %s799_s12 }
  0x49   : > { %s1395_s17 = scalar_select %p46_p12, %s1179_s23, %s48_s13  }
  0x4a   : > { %s1400_s20 = scalar_lea.hbm %s1614_s0, %s800_s16  ;;  %s287_s28 = sshll.u32 %s279_s9, 4  ;;  %s1408_s28 = int_to_ptr.vmem [resolvable:$true] %s287_s28 }
  0x4b   : > { %p1404_p11 = pnand %p882_p3, %p57_p5  ;;  %s276_s13 = scalar_lea.sflag [#allocation3], %s275_s15 }
  0x4c   : > { %s1015_s14 = scalar_lea.hbm %s1400_s20, 128  ;;  %s1020_s18 = scalar_lea.hbm %s1614_s0, 256 }
  0x4d   : > { %p1016_p0 = scmp.ne.s32.totalorder %s1400_s20, %s1015_s14  ;;  %p1017_p2 = pneg %p1404_p11 }
  0x4e   : > { %p1021_p6 = scmp.lt.u32.totalorder %s1400_s20, %s1614_s0  ;;  %p1022_p10 = scmp.lt.u32.totalorder %s1020_s18, %s1015_s14 }
  0x4f   : > { %p1018_p1 = pnand %p1017_p2, %p1016_p0  ;;  %p1024_p5 = scmp.lt.u32.totalorder %s1015_s14, %s1400_s20 }
  0x50   : > { %p1023_p3 = por %p1022_p10, %p1021_p6 }
  0x51   : > { %p1019_p13 = pneg %p1018_p1 }
  0x52   : > { %p1025_p7 = por %p1024_p5, %p1023_p3 }
  0x54   : > { %p1026_p12 = pnand %p1025_p7, %p1019_p13 }
  0x56   : > { %1029 = shalt.err (!%p1026_p12)
}
  0x57   : > { %s1030_s15 = scalar_lea.vmem %s1408_s28, 128  ;;  %s1197_s12 = smov [#allocation2]  }
  0x58   : > { %p1031_p0 = scmp.ne.s32.totalorder %s1408_s28, %s1030_s15  ;;  %s1035_s16 = sshll.u32 %s1197_s12, 4  ;;  %s1036_s16 = int_to_ptr.vmem [resolvable:$false] %s1035_s16 }
  0x59   : > { %s1037_s19 = scalar_lea.vmem %s1036_s16, 256  ;;  %p1038_p4 = scmp.lt.s32.totalorder %s1408_s28, %s1036_s16 }
  0x5a   : > { %p1033_p1 = pnand %p1031_p0, %p1017_p2  ;;  %p1039_p6 = scmp.lt.s32.totalorder %s1037_s19, %s1030_s15 }
  0x5c   : > { %p1034_p9 = pneg %p1033_p1  ;;  %p1040_p10 = por %p1039_p6, %p1038_p4 }
  0x5e   : > { %p1041_p3 = pnand %p1040_p10, %p1034_p9 }
  0x60   : > { %1044 = shalt.err (!%p1041_p3)
}
  0x61   : > { %869 = dma.hbm_to_vmem [thread:$0]  (!%p1404_p11), %s1400_s20, 128, %s1408_s28, %s276_s13  }
  0x62   : > { %296 = sbr.rel (%p1307_p8) target bundleno = 727 (0x2d7), region = 36  ;;  %s1438_s14 = sand.u32 (!%p1307_p8), 1, %s1175_s22  }
  0x63   : > { %s1441_s18 = sshll.u32 (!%p1307_p8), %s1438_s14, 3  ;;  %s299_s9 = scalar_lea.sflag (!%p1307_p8), [#allocation3], %s1438_s14 }
  0x64   : > { %s302_s15 = scalar_lea.vmem (!%p1307_p8), [#allocation2], %s1441_s18  ;;  %p1636_p4 = scmp.ne.s32.totalorder (!%p1307_p8), %s1629_s29, 0 }
  0x69   : > { %1154 = dma.done.wait (%p1636_p4), %s299_s9, 128  }
  0x6a   : > { %1156 = vsyncadd (%p1636_p4), %s299_s9, 4294967168  ;;  %p1637_p9 = scmp.eq.s32.totalorder %s1286_s27, 0 }
  0x6c   : > { %1158 = dma.done.wait (%p1637_p9), [#allocation6], 384   ;;  %p1638_p8 = pmov %p1637_p9 }
  0x6d   : > { %v1198_v0 = vmov 0.0   ;;  %vm1199_vm0 = vmmov 0   ;;  %v957_v1 = vld [vmem:[#allocation5] sm:$0xff]   ;;  %v958_v2 = vld [vmem:[#allocation5 + $0x8] sm:$0xff]   ;;  %v358_v3 = vld [vmem:[%s302_s15] sm:$0xff]  ;;  %s1200_s7 = smov 8  }
  0x6e   : > { %1160 = vsyncadd (%p1638_p8), [#allocation6], 4294966912  ;;  %835 = vmatprep.subr.bf16.mxu0 %v1198_v0  ;;  %839 = vmatprep.mubr.msk.bf16.mxu0 %vm1199_vm0, %v1198_v0  ;;  %v420_v4 = vld [vmem:[#allocation7] sm:$0xff]  ;;  %s1201_s28 = smov 16   ;;  %v359_v6 = vpack.c.bf16 %v358_v3, %v358_v3  ;;  %vm376_vm1 = vcmask 261120   ;;  %s1202_s8 = smov 24  }
  0x6f   : > { %836 = vmatpush3.bf16.msra.mxu0 %v957_v1  ;;  %423 = vrot.lane.b32.xlu0 %v420_v4, %s1200_s7  ;;  %v421_v5 = vld [vmem:[%s1617_s3] sm:$0xff]  ;;  %vm432_vm2 = vcmask 64512   ;;  %vm434_vm3 = vcmask 130048   ;;  %vm436_vm4 = vcmask 195584   ;;  %s1203_s13 = smov 104   ;;  %s1204_s12 = smov 88  }
  0x70   : > { %837 = vmatprep.subr.bf16.mxu0 %v1198_v0  ;;  %426 = vrot.lane.b32.xlu1 %v420_v4, %s1201_s28  ;;  %s1205_s16 = smov 112   ;;  %s1206_s19 = smov 32   ;;  %vm486_vm5 = vcmask 31744   ;;  %vm489_vm6 = vcmask 60416  }
  0x71   : > { %s1207_s9 = smov 124   ;;  %s1208_s15 = smov 116  }
  0x72   : > { %s1210_s29 = smov 108   ;;  %s1211_s20 = smov 92  }
  0x73   : > { %838 = vmatpush3.bf16.msra.mxu0 %v958_v2  ;;  %439 = vrot.lane.b32.xlu0 %v421_v5, %s1200_s7  ;;  %s1209_s7 = smov 120   ;;  %p1639_p2 = scmp.ne.s32.totalorder %s1634_s10, 0 }
  0x74   : > { %442 = vrot.lane.b32.xlu1 %v421_v5, %s1201_s28 }
  0x76   : > { %840 = vmatmul.mubr.msk.bf16.vlgmr.msra.gmra.mrb[0].mxu0 %vm376_vm1, %v359_v6 }
  0x77   : > { %429 = vrot.lane.b32.xlu0 %v420_v4, %s1202_s8 }
  0x78   : > { %445 = vrot.lane.b32.xlu1 %v421_v5, %s1202_s8  ;;  %s805_s8 = sshll.u32 %s1438_s14, 4 }
  0xe1   : > { %v424_v7 = vpop.permute.xlu0 %423 }
  0xe2   : > { %v427_v8 = vpop.permute.xlu1 %426  ;;  %v433_v15 = vsel %vm432_vm2, %v420_v4, %v424_v7 }
  0xe3   : > { %v435_v16 = vsel %vm434_vm3, %v433_v15, %v427_v8 }
  0xe5   : > { %v440_v9 = vpop.permute.xlu0 %439 }
  0xe6   : > { %v448_v10 = vsel %vm432_vm2, %v421_v5, %v440_v9  ;;  %v443_v11 = vpop.permute.xlu1 %442 }
  0xe7   : > { %v449_v12 = vsel %vm434_vm3, %v448_v10, %v443_v11 }
  0xe9   : > { %v430_v17 = vpop.permute.xlu0 %429 }
  0xea   : > { %v446_v13 = vpop.permute.xlu1 %445  ;;  %v437_v18 = vsel %vm436_vm4, %v435_v16, %v430_v17 }
  0xeb   : > { %v450_v14 = vsel %vm436_vm4, %v449_v12, %v446_v13 }
 0x149   : > { %v414_v19 = vpop.f32.mrb[0].mxu0 }
 0x14a   : > { %464 = vrot.lane.b32.xlu1 %v414_v19, %s1203_s13  ;;  %v841_v20 = vpop.f32.mrb[1].mxu0  ;;  %v451_v21 = vsub.f32 0.0, %v414_v19  ;;  %v468_v22 = vmul.f32 %v437_v18, %v414_v19  ;;  %v828_v38 = vpack.c.bf16 %v414_v19, %v414_v19 }
 0x14b   : > { %v417_v23 = vpop.f32.mrb[2].mxu0 }
 0x14c   : > { %461 = vrot.lane.b32.xlu0 %v451_v21, %s1204_s12  ;;  %v842_v24 = vpop.f32.mrb[3].mxu0 }
 0x14e   : > { %457 = vrot.lane.b32.xlu1 %v414_v19, %s1201_s28  ;;  %s1212_s28 = smov 96  }
 0x150   : > { %453 = vrot.lane.b32.xlu0 %v451_v21, %s1205_s16 }
 0x154   : > { %472 = vrot.lane.b32.xlu0 %v437_v18, %s1206_s19 }
 0x1bc   : > { %v465_v25 = vpop.permute.xlu1 %464 }
 0x1be   : > { %v462_v26 = vpop.permute.xlu0 %461 }
 0x1bf   : > { %v467_v27 = vsel %vm432_vm2, %v462_v26, %v465_v25 }
 0x1c0   : > { %v476_v28 = vmul.f32 %v467_v27, %v450_v14  ;;  %v458_v29 = vpop.permute.xlu1 %457 }
 0x1c2   : > { %478 = vrot.lane.b32.xlu1 %v476_v28, %s1206_s19  ;;  %v454_v30 = vpop.permute.xlu0 %453 }
 0x1c3   : > { %v460_v31 = vsel %vm434_vm3, %v454_v30, %v458_v29 }
 0x1c4   : > { %v469_v32 = vmul.f32 %v460_v31, %v450_v14 }
 0x1c6   : > { %v470_v33 = vadd.f32 %v469_v32, %v468_v22  ;;  %v473_v34 = vpop.permute.xlu0 %472 }
 0x1c7   : > { %v475_v35 = vmul.f32 %v473_v34, %v414_v19 }
 0x1c8   : > { %491 = vrot.lane.b32.xlu0 %v470_v33, %s1207_s9  ;;  %483 = vrot.lane.b32.xlu1 %v470_v33, %s1208_s15  ;;  %s1214_s9 = smov 72   ;;  %s829_s15 = sshll.u32 %s1183_s24, 8 }
 0x1cc   : > { %501 = vrot.lane.b32.xlu0 %v470_v33, %s1209_s7  ;;  %494 = vrot.lane.b32.xlu1 %v470_v33, %s1205_s16  ;;  %s338_s16 = scalar_lea.vmem [#allocation8], %s805_s8  ;;  %s1215_s8 = smov [#allocation8]  }
 0x1cd   : > { %s573_s19 = sshll.u32 %s338_s16, 4  ;;  %s1474_s19 = int_to_ptr.vmem [resolvable:$true] %s573_s19 }
 0x1d0   : > { %511 = vrot.lane.b32.xlu0 %v470_v33, %s1203_s13  ;;  %504 = vrot.lane.b32.xlu1 %v470_v33, %s1210_s29  ;;  %s1213_s13 = smov 80   ;;  %s1482_s29 = scalar_lea.hbm %s1618_s4, %s829_s15 }
 0x234   : > { %v479_v36 = vpop.permute.xlu1 %478 }
 0x235   : > { %v481_v37 = vadd.f32 %v479_v36, %v475_v35 }
 0x237   : > { %522 = vrot.lane.b32.xlu1 %v481_v37, %s1211_s20  ;;  %519 = vrot.lane.b32.xlu0 %v481_v37, %s1212_s28  ;;  %s549_s20 = scalar_lea.sflag [#allocation4], %s1438_s14  ;;  %s1045_s28 = scalar_lea.vmem %s1474_s19, 256 }
 0x238   : > { %p1046_p11 = scmp.ne.s32.totalorder %s1474_s19, %s1045_s28 }
 0x23a   : > { %v484_v39 = vpop.permute.xlu1 %483  ;;  %v492_v40 = vpop.permute.xlu0 %491  ;;  %p1047_p13 = pnand %p1046_p11, %p1639_p2 }
 0x23b   : > { %v487_v41 = vsel %vm486_vm5, %v470_v33, %v484_v39  ;;  %532 = vrot.lane.b32.xlu1 %v828_v38, %s1213_s13  ;;  %536 = vrot.lane.b32.xlu0 %v481_v37, %s1204_s12  ;;  %s1049_s13 = sshll.u32 %s1215_s8, 4  ;;  %s1050_s13 = int_to_ptr.vmem [resolvable:$false] %s1049_s13 }
 0x23c   : > { %v488_v42 = vpack.c.bf16 %v487_v41, %v487_v41  ;;  %p1048_p5 = pneg %p1047_p13  ;;  %p1052_p7 = scmp.lt.s32.totalorder %s1474_s19, %s1050_s13 }
 0x23e   : > { %490 = vst.msk [vmem:[%s338_s16] sm:$0xf] %vm489_vm6, %v488_v42  ;;  %v495_v43 = vpop.permute.xlu1 %494  ;;  %v502_v44 = vpop.permute.xlu0 %501 }
 0x23f   : > { %v497_v45 = vsel %vm486_vm5, %v492_v40, %v495_v43  ;;  %543 = vrot.lane.b32.xlu0 %v828_v38, %s1214_s9  ;;  %s1051_s9 = scalar_lea.vmem %s1050_s13, 512 }
 0x240   : > { %v498_v46 = vpack.c.bf16 %v497_v45, %v497_v45  ;;  %p1053_p12 = scmp.lt.s32.totalorder %s1051_s9, %s1045_s28 }
 0x242   : > { %811 = vst.msk [vmem:[%s338_s16 + $0x4] sm:$0xf] %vm489_vm6, %v498_v46  ;;  %v505_v47 = vpop.permute.xlu1 %504  ;;  %v512_v48 = vpop.permute.xlu0 %511  ;;  %p1054_p0 = por %p1053_p12, %p1052_p7 }
 0x243   : > { %v507_v49 = vsel %vm486_vm5, %v502_v44, %v505_v47  ;;  %v514_v50 = vsel %vm486_vm5, %v484_v39, %v512_v48 }
 0x244   : > { %v508_v51 = vpack.c.bf16 %v507_v49, %v507_v49  ;;  %v515_v52 = vpack.c.bf16 %v514_v50, %v514_v50  ;;  %p1055_p1 = pnand %p1054_p0, %p1048_p5 }
 0x246   : > { %812 = vst.msk [vmem:[%s338_s16 + $0x8] sm:$0xf] %vm489_vm6, %v508_v51  ;;  %813 = vst.msk [vmem:[%s338_s16 + $0xc] sm:$0xf] %vm489_vm6, %v515_v52 }
 0x247   : > { %1058 = shalt.err (!%p1055_p1)
}
 0x248   : > { %s1059_s16 = scalar_lea.hbm %s1482_s29, 256  ;;  %s1063_s7 = scalar_lea.hbm %s1618_s4, 512 }
 0x249   : > { %p1060_p6 = scmp.ne.s32.totalorder %s1482_s29, %s1059_s16  ;;  %p1064_p4 = scmp.lt.u32.totalorder %s1482_s29, %s1618_s4 }
 0x24a   : > { %p1065_p9 = scmp.lt.u32.totalorder %s1063_s7, %s1059_s16  ;;  %p1067_p11 = scmp.lt.u32.totalorder %s1059_s16, %s1482_s29 }
 0x24b   : > { %p1061_p10 = pnand %p1060_p6, %p1639_p2 }
 0x24c   : > { %p1066_p8 = por %p1065_p9, %p1064_p4 }
 0x24d   : > { %p1062_p3 = pneg %p1061_p10 }
 0x24e   : > { %p1068_p13 = por %p1067_p11, %p1066_p8 }
 0x250   : > { %p1069_p5 = pnand %p1068_p13, %p1062_p3 }
 0x252   : > { %1072 = shalt.err (!%p1069_p5)
}
 0x253   : > { %s1625_s28 = smov 64   ;;  %s1627_s9 = smov 4  }
 0x254   : > { %853 = dma.vmem_to_hbm [thread:$0]  (%p1639_p2), %s1474_s19, 256, %s1482_s29, %s549_s20, %s1625_s28, %s1625_s28, %s1627_s9  }
 0x255   : > { %s553_s16 = sand.u32 1, %s1286_s27   ;;  %s830_s15 = sshll.u32 %s1183_s24, 7 }
 0x256   : > { %s345_s12 = scalar_lea.vmem [#allocation9], %s1441_s18  ;;  %s352_s8 = scalar_lea.vmem [#allocation11], %s1441_s18 }
 0x257   : > { %s590_s7 = sshll.u32 %s345_s12, 4  ;;  %s607_s13 = sshll.u32 %s352_s8, 4  ;;  %s1526_s7 = int_to_ptr.vmem [resolvable:$true] %s590_s7  ;;  %s1528_s13 = int_to_ptr.vmem [resolvable:$true] %s607_s13 }
 0x258   : > { %s1524_s29 = scalar_lea.hbm %s1619_s5, %s830_s15  ;;  %s1533_s18 = scalar_lea.hbm %s1620_s6, %s830_s15 }
 0x259   : > { %s1537_s20 = scalar_lea.sflag [#allocation10], %s553_s16  ;;  %s1073_s14 = scalar_lea.vmem %s1526_s7, 128 }
 0x25a   : > { %p1074_p7 = scmp.ne.s32.totalorder %s1526_s7, %s1073_s14  ;;  %s1218_s19 = smov [#allocation9]  }
 0x25b   : > { %s1077_s28 = sshll.u32 %s1218_s19, 4  ;;  %s1078_s28 = int_to_ptr.vmem [resolvable:$false] %s1077_s28 }
 0x25c   : > { %p1075_p12 = pnand %p1074_p7, %p1639_p2  ;;  %s1079_s9 = scalar_lea.vmem %s1078_s28, 256 }
 0x25d   : > { %p1080_p1 = scmp.lt.s32.totalorder %s1526_s7, %s1078_s28  ;;  %p1081_p6 = scmp.lt.s32.totalorder %s1079_s9, %s1073_s14 }
 0x25e   : > { %p1076_p0 = pneg %p1075_p12 }
 0x25f   : > { %p1082_p10 = por %p1081_p6, %p1080_p1 }
 0x261   : > { %p1083_p3 = pnand %p1082_p10, %p1076_p0 }
 0x2a9   : > { %v523_v53 = vpop.permute.xlu1 %522  ;;  %v520_v54 = vpop.permute.xlu0 %519 }
 0x2aa   : > { %v525_v55 = vsel %vm486_vm5, %v520_v54, %v523_v53 }
 0x2ab   : > { %v526_v56 = vpack.c.bf16 %v525_v55, %v525_v55 }
 0x2ad   : > { %527 = vst.msk [vmem:[%s345_s12] sm:$0xf] %vm489_vm6, %v526_v56  ;;  %v533_v57 = vpop.permute.xlu1 %532  ;;  %v537_v58 = vpop.permute.xlu0 %536 }
 0x2ae   : > { %535 = vst.msk [vmem:[%s352_s8] sm:$0xf] %vm489_vm6, %v533_v57  ;;  %v539_v59 = vsel %vm486_vm5, %v523_v53, %v537_v58 }
 0x2af   : > { %v540_v60 = vpack.c.bf16 %v539_v59, %v539_v59 }
 0x2b1   : > { %815 = vst.msk [vmem:[%s345_s12 + $0x4] sm:$0xf] %vm489_vm6, %v540_v60  ;;  %v544_v61 = vpop.permute.xlu0 %543 }
 0x2b2   : > { %816 = vst.msk [vmem:[%s352_s8 + $0x4] sm:$0xf] %vm489_vm6, %v544_v61 }
 0x2b3   : > { %1086 = shalt.err (!%p1083_p3)
}
 0x2b4   : > { %s1087_s16 = scalar_lea.hbm %s1524_s29, 128  ;;  %s1091_s8 = scalar_lea.hbm %s1619_s5, 256 }
 0x2b5   : > { %p1088_p4 = scmp.ne.s32.totalorder %s1524_s29, %s1087_s16  ;;  %p1092_p11 = scmp.lt.u32.totalorder %s1524_s29, %s1619_s5 }
 0x2b6   : > { %p1093_p13 = scmp.lt.u32.totalorder %s1091_s8, %s1087_s16  ;;  %p1095_p7 = scmp.lt.u32.totalorder %s1087_s16, %s1524_s29 }
 0x2b7   : > { %p1089_p9 = pnand %p1088_p4, %p1639_p2 }
 0x2b8   : > { %p1094_p5 = por %p1093_p13, %p1092_p11 }
 0x2b9   : > { %p1090_p8 = pneg %p1089_p9 }
 0x2ba   : > { %p1096_p12 = por %p1095_p7, %p1094_p5 }
 0x2bc   : > { %p1097_p0 = pnand %p1096_p12, %p1090_p8 }
 0x2be   : > { %1100 = shalt.err (!%p1097_p0)
}
 0x2bf   : > { %s1640_s9 = smov 4   ;;  %s1641_s27 = smov 64  }
 0x2c0   : > { %854 = dma.vmem_to_hbm [thread:$0]  (%p1639_p2), %s1526_s7, 128, %s1524_s29, %s1537_s20, %s1641_s27, %s1641_s27, %s1640_s9  }
 0x2c1   : > { %s1101_s14 = scalar_lea.vmem %s1528_s13, 128  ;;  %s1219_s19 = smov [#allocation11]  }
 0x2c2   : > { %p1102_p1 = scmp.ne.s32.totalorder %s1528_s13, %s1101_s14  ;;  %s1105_s16 = sshll.u32 %s1219_s19, 4  ;;  %s1106_s16 = int_to_ptr.vmem [resolvable:$false] %s1105_s16 }
 0x2c3   : > { %s1107_s15 = scalar_lea.vmem %s1106_s16, 256  ;;  %p1108_p3 = scmp.lt.s32.totalorder %s1528_s13, %s1106_s16 }
 0x2c4   : > { %p1103_p6 = pnand %p1102_p1, %p1639_p2  ;;  %p1109_p4 = scmp.lt.s32.totalorder %s1107_s15, %s1101_s14 }
 0x2c6   : > { %p1104_p10 = pneg %p1103_p6  ;;  %p1110_p9 = por %p1109_p4, %p1108_p3 }
 0x2c8   : > { %p1111_p8 = pnand %p1110_p9, %p1104_p10 }
 0x2ca   : > { %1114 = shalt.err (!%p1111_p8)
}
 0x2cb   : > { %s1115_s7 = scalar_lea.hbm %s1533_s18, 128  ;;  %s1119_s8 = scalar_lea.hbm %s1620_s6, 256 }
 0x2cc   : > { %p1116_p11 = scmp.ne.s32.totalorder %s1533_s18, %s1115_s7  ;;  %p1120_p7 = scmp.lt.u32.totalorder %s1533_s18, %s1620_s6 }
 0x2cd   : > { %p1121_p12 = scmp.lt.u32.totalorder %s1119_s8, %s1115_s7  ;;  %p1123_p1 = scmp.lt.u32.totalorder %s1115_s7, %s1533_s18 }
 0x2ce   : > { %p1117_p13 = pnand %p1116_p11, %p1639_p2 }
 0x2cf   : > { %p1122_p0 = por %p1121_p12, %p1120_p7 }
 0x2d0   : > { %p1118_p5 = pneg %p1117_p13 }
 0x2d1   : > { %p1124_p6 = por %p1123_p1, %p1122_p0 }
 0x2d3   : > { %p1125_p10 = pnand %p1124_p6, %p1118_p5 }
 0x2d5   : > { %1128 = shalt.err (!%p1125_p10)
}
 0x2d6   : > { %855 = dma.vmem_to_hbm [thread:$0]  (%p1639_p2), %s1528_s13, 128, %s1533_s18, %s1537_s20, %s1641_s27, %s1641_s27, %s1640_s9  }
 0x2d7 PF: > { %s622_s14 = sand.u32 1, %s1171_s21   ;;  %p1642_p3 = scmp.ne.s32.totalorder %s1630_s30, 0 }
 0x2d8   : > { %p1643_p4 = scmp.ge.s32.totalorder %s1191_s26, 2  ;;  %s623_s19 = scalar_lea.sflag [#allocation4], %s622_s14 }
 0x2da   : > { %p871_p9 = pnand %p1643_p4, %p1642_p3 }
 0x2dc   : > { %1162 = dma.done.wait (!%p871_p9), %s623_s19, 256  }
 0x2dd   : > { %1164 = vsyncadd (!%p871_p9), %s623_s19, 4294967040  ;;  %s1644_s10 = sadd.s32 4294967294, %s1191_s26  }
 0x2de   : > { %s631_s16 = sand.u32 1, %s1644_s10  }
 0x2df   : > { %s632_s15 = scalar_lea.sflag [#allocation10], %s631_s16 }
 0x2e0   : > { %1166 = dma.done.wait (!%p871_p9), %s632_s15, 256  }
 0x2e1   : > { %1168 = vsyncadd (!%p871_p9), %s632_s15, 4294967040  ;;  %s27_s26 = sadd.s32 1, %s1191_s26   ;;  %s1645_s21 = smov %s1175_s22 }
 0x2e2   : > { %p24_p2 = scmp.ge.s32.totalorder %s27_s26, 4   ;;  %s1646_s22 = smov %s1179_s23 }
 0x2e3   : > { %s1647_s23 = smov %s1395_s17  ;;  %s1648_s24 = smov %s1187_s25 }
 0x2e4   : > { %s1649_s25 = smov %s1651_s11  ;;  %26 = sbr.rel (!%p24_p2) target bundleno = 9 (0x9), region = 130 }
 0x2eb   :  { %646 = vsyncpa [#allocation3], 1 }
 0x2ec   :  { %648 = vsyncpa [#allocation3 + $0x1], 1 }
 0x2ed   :  { %649 = vsyncpa [#allocation6], 1 }
 0x2ee   :  { %650 = vsyncpa [#allocation4], 1 }
 0x2ef   :  { %652 = vsyncpa [#allocation4 + $0x1], 1 }
 0x2f0   :  { %653 = vsyncpa [#allocation10], 1 }
 0x2f1   :  { %655 = vsyncpa [#allocation10 + $0x1], 1 }

</bundles_post_ra>
